<compile_context>
chip_gen: v5e
topology: v5e:2x2
jax: 0.10.0
libtpu: 0.0.40
codegen_flags: <defaults>
</compile_context>

<pallas_src>
import jax
import jax.numpy as jnp
from jax.experimental import pallas as pl
from jax.experimental.pallas import tpu as pltpu


def critic_kernel(x_ref, w1_ref, b1_ref, w2_ref, b2_ref, o_ref):
    # fc1 on the MXU: (TM, In) @ (In, H), f32 accumulator; bias + ReLU on the VPU.
    h = jnp.dot(x_ref[...], w1_ref[...], preferred_element_type=jnp.float32)
    h = jnp.maximum(h + b1_ref[...], 0.0)          # (TM, H), broadcast (1, H)

    # fc2 as VPU multiply + XLU row-reduce instead of an N=1 MXU matmul.
    # w2_ref is the (1, H) row of the second layer's weights.
    v = jnp.sum(h * w2_ref[...], axis=-1, keepdims=True)   # (TM, 1)
    v = v + b2_ref[0, 0]                                    # scalar bias from SMEM
    o_ref[...] = v.astype(o_ref.dtype)


def critic_forward(x, w1, b1, w2, b2, *, block_rows=512):
    """x: (B, In); w1: (In, H); b1: (1, H); w2: (H, 1); b2: (1, 1) -> (B, 1)."""
    B, in_dim = x.shape
    hidden = w1.shape[1]

    w2_row = w2.reshape(1, hidden)   # (1, H) row for the VPU/XLU fc2 path
    b2_s = b2.reshape(1, 1)          # scalar, goes to SMEM

    # Batch tile: multiple of 8 (f32 sublane), at most `block_rows` rows.
    # A 512x32 f32 x-tile is 64 KiB, so double-buffering is cheap even under
    # v7x's 64 MiB VMEM budget.
    tm = min(block_rows, pl.cdiv(B, 8) * 8)
    b_pad = pl.cdiv(B, tm) * tm
    if b_pad != B:
        x = jnp.pad(x, ((0, b_pad - B), (0, 0)))

    out = pl.pallas_call(
        critic_kernel,
        out_shape=jax.ShapeDtypeStruct((b_pad, 1), jnp.float32),
        grid=(b_pad // tm,),
        in_specs=[
            # x tile: pipelined (double-buffered) across the batch grid.
            pl.BlockSpec((tm, in_dim), lambda i: (i, 0)),
            # Weights / biases: same block every step -> stay resident in VMEM.
            pl.BlockSpec((in_dim, hidden), lambda i: (0, 0)),
            pl.BlockSpec((1, hidden), lambda i: (0, 0)),
            pl.BlockSpec((1, hidden), lambda i: (0, 0)),
            # b2 as a scalar in SMEM (avoids a padded 8x128 VMEM tile + vld).
            pl.BlockSpec((1, 1), lambda i: (0, 0),
                         memory_space=pltpu.MemorySpace.SMEM),
        ],
        out_specs=pl.BlockSpec((tm, 1), lambda i: (i, 0)),
        compiler_params=pltpu.CompilerParams(
            dimension_semantics=("parallel",),   # shards across v7x's 2 TCs
        ),
    )(x, w1, b1, w2_row, b2_s)

    return out[:B]


def init_critic_params(key, input_dim, hidden_dim):
    # Deterministic init mimicking PyTorch's nn.Linear default:
    # U(-1/sqrt(fan_in), 1/sqrt(fan_in)) for both weight and bias.
    k1, k2, k3, k4 = jax.random.split(key, 4)
    bound1 = 1.0 / jnp.sqrt(jnp.float32(input_dim))
    bound2 = 1.0 / jnp.sqrt(jnp.float32(hidden_dim))
    w1 = jax.random.uniform(k1, (input_dim, hidden_dim), jnp.float32,
                            minval=-bound1, maxval=bound1)
    b1 = jax.random.uniform(k2, (1, hidden_dim), jnp.float32,
                            minval=-bound1, maxval=bound1)
    w2 = jax.random.uniform(k3, (hidden_dim, 1), jnp.float32,
                            minval=-bound2, maxval=bound2)
    b2 = jax.random.uniform(k4, (1, 1), jnp.float32,
                            minval=-bound2, maxval=bound2)
    return w1, b1, w2, b2


if __name__ == "__main__":
    key = jax.random.PRNGKey(0)
    k_x, k_p = jax.random.split(key)

    # batch=12 deliberately NOT a multiple of 8 to exercise the pad/slice path.
    batch, input_dim, hidden_dim = 12, 32, 32
    x = jax.random.normal(k_x, (batch, input_dim), jnp.float32)
    w1, b1, w2, b2 = init_critic_params(k_p, input_dim, hidden_dim)

    out = critic_forward(x, w1, b1, w2, b2)
    out = jax.block_until_ready(out)

    # Reference check against plain JAX (same semantics as the PyTorch module).
    ref = jnp.maximum(x @ w1 + b1, 0.0) @ w2 + b2
    assert out.shape == (batch, 1)
    assert jnp.allclose(out, ref, atol=1e-4, rtol=1e-4)

    print("KERNEL_OK")
</pallas_src>

<mosaic_0001>
module attributes {stable_mosaic.version = 11 : i64} {
  func.func @critic_kernel(%arg0: i32, %arg1: memref<16x32xf32, #tpu.memory_space<vmem>>, %arg2: memref<32x32xf32, #tpu.memory_space<vmem>>, %arg3: memref<1x32xf32, #tpu.memory_space<vmem>>, %arg4: memref<1x32xf32, #tpu.memory_space<vmem>>, %arg5: memref<1x1xf32, #tpu.memory_space<smem>>, %arg6: memref<16x1xf32, #tpu.memory_space<vmem>>) attributes {dimension_semantics = [#tpu.dimension_semantics<parallel>], iteration_bounds = array<i64: 1>, scalar_prefetch = 0 : i64, scratch_operands = 0 : i64, tpu.core_type = #tpu.core_type<tc>, window_params = [{transform_indices = @transform_0, window_bounds = array<i64: 16, 32>}, {pipeline_mode = #tpu.pipeline_mode<synchronous>, transform_indices = @transform_1, window_bounds = array<i64: 32, 32>}, {pipeline_mode = #tpu.pipeline_mode<synchronous>, transform_indices = @transform_2, window_bounds = array<i64: 1, 32>}, {pipeline_mode = #tpu.pipeline_mode<synchronous>, transform_indices = @transform_3, window_bounds = array<i64: 1, 32>}, {transform_indices = @transform_4, window_bounds = array<i64: 1, 1>}, {transform_indices = @transform_5, window_bounds = array<i64: 16, 1>}]} {
    %c0 = arith.constant 0 : index
    %c0_0 = arith.constant 0 : index
    %0 = vector.load %arg1[%c0, %c0_0] : memref<16x32xf32, #tpu.memory_space<vmem>>, vector<16x32xf32>
    %c0_1 = arith.constant 0 : index
    %c0_2 = arith.constant 0 : index
    %1 = vector.load %arg2[%c0_1, %c0_2] : memref<32x32xf32, #tpu.memory_space<vmem>>, vector<32x32xf32>
    %cst = arith.constant dense<0.000000e+00> : vector<16x32xf32>
    %2 = tpu.matmul %0, %1, %cst {dimension_numbers = #tpu.dot_dimension_numbers<[1], [0], [0], [1], [0, 0, 1, 1], [], []>} : vector<16x32xf32>, vector<32x32xf32>, vector<16x32xf32> -> vector<16x32xf32>
    %c0_3 = arith.constant 0 : index
    %c0_4 = arith.constant 0 : index
    %3 = vector.load %arg3[%c0_3, %c0_4] : memref<1x32xf32, #tpu.memory_space<vmem>>, vector<1x32xf32>
    %4 = vector.broadcast %3 : vector<1x32xf32> to vector<16x32xf32>
    %5 = arith.addf %2, %4 : vector<16x32xf32>
    %cst_5 = arith.constant 0.000000e+00 : f32
    %6 = vector.broadcast %cst_5 : f32 to vector<16x32xf32>
    %7 = arith.maximumf %5, %6 : vector<16x32xf32>
    %c0_6 = arith.constant 0 : index
    %c0_7 = arith.constant 0 : index
    %8 = vector.load %arg4[%c0_6, %c0_7] : memref<1x32xf32, #tpu.memory_space<vmem>>, vector<1x32xf32>
    %9 = vector.broadcast %8 : vector<1x32xf32> to vector<16x32xf32>
    %10 = arith.mulf %7, %9 : vector<16x32xf32>
    %cst_8 = arith.constant dense<0.000000e+00> : vector<16xf32>
    %11 = vector.multi_reduction <add>, %10, %cst_8 [1] : vector<16x32xf32> to vector<16xf32>
    %12 = vector.shape_cast %11 : vector<16xf32> to vector<16x1xf32>
    %c0_9 = arith.constant 0 : index
    %c0_10 = arith.constant 0 : index
    %13 = memref.load %arg5[%c0_9, %c0_10] : memref<1x1xf32, #tpu.memory_space<smem>>
    %14 = vector.broadcast %13 : f32 to vector<16x1xf32>
    %15 = arith.addf %12, %14 : vector<16x1xf32>
    %c0_11 = arith.constant 0 : index
    %c0_12 = arith.constant 0 : index
    %16 = vector.load %arg6[%c0_11, %c0_12] : memref<16x1xf32, #tpu.memory_space<vmem>>, vector<16x1xf32>
    tpu.vector_store %arg6[%c0_11, %c0_12], %15 {strides = array<i32>} : memref<16x1xf32, #tpu.memory_space<vmem>>, vector<16x1xf32>,
    return
  }
  func.func @transform_0(%arg0: i32) -> (i32, i32) {
    %c0_i32 = arith.constant 0 : i32
    %c0_i32_0 = arith.constant 0 : i32
    return %arg0, %c0_i32 : i32, i32
  }
  func.func @transform_1(%arg0: i32) -> (i32, i32) {
    %c0_i32 = arith.constant 0 : i32
    %c0_i32_0 = arith.constant 0 : i32
    %c0_i32_1 = arith.constant 0 : i32
    return %c0_i32, %c0_i32_0 : i32, i32
  }
  func.func @transform_2(%arg0: i32) -> (i32, i32) {
    %c0_i32 = arith.constant 0 : i32
    %c0_i32_0 = arith.constant 0 : i32
    %c0_i32_1 = arith.constant 0 : i32
    return %c0_i32, %c0_i32_0 : i32, i32
  }
  func.func @transform_3(%arg0: i32) -> (i32, i32) {
    %c0_i32 = arith.constant 0 : i32
    %c0_i32_0 = arith.constant 0 : i32
    %c0_i32_1 = arith.constant 0 : i32
    return %c0_i32, %c0_i32_0 : i32, i32
  }
  func.func @transform_4(%arg0: i32) -> (i32, i32) {
    %c0_i32 = arith.constant 0 : i32
    %c0_i32_0 = arith.constant 0 : i32
    %c0_i32_1 = arith.constant 0 : i32
    return %c0_i32, %c0_i32_0 : i32, i32
  }
  func.func @transform_5(%arg0: i32) -> (i32, i32) {
    %c0_i32 = arith.constant 0 : i32
    %c0_i32_0 = arith.constant 0 : i32
    return %arg0, %c0_i32 : i32, i32
  }
}

</mosaic_0001>

<bundles_post_ra>
// kernel: tpu_custom_call.1
= control target key start
LH: loop header
LB: loop body
LE: loop exit
PB: predicated region body
PF: predicated region fallthrough
CT: control target
= control target key end

     0   :  { %11 = vsyncpa [#allocation4], 0  ;;  %s243_s0 = inlined_call_operand.hbm [shape: f32[16,32], index: 0, kind: input, shape index: {}]   ;;  %s244_s1 = inlined_call_operand.hbm [shape: f32[32,32], index: 1, kind: input, shape index: {}]   ;;  %s245_s2 = inlined_call_operand.vmem [shape: f32[1,32], index: 2, kind: input, shape index: {}]   ;;  %s246_s3 = inlined_call_operand.vmem [shape: f32[1,32], index: 3, kind: input, shape index: {}]   ;;  %s247_s4 = inlined_call_operand.<no memory space> [shape: f32[1,1], index: 4, kind: input, shape index: {}]   ;;  %s248_s5 = inlined_call_operand.vmem [shape: f32[16,1], index: 5, kind: output, shape index: {}]  }
   0x1   :  { %s17_s20 = sshll.u32 %s243_s0, 4  ;;  %s18_s20 = int_to_ptr.hbm [resolvable:$true] %s17_s20 }
   0x2   :  { %12 = vsyncpa [#allocation6], 0  ;;  %s184_s21 = smov [#allocation3]   ;;  %s30_s25 = sshll.u32 %s244_s1, 4  ;;  %s31_s25 = int_to_ptr.hbm [resolvable:$true] %s30_s25 }
   0x3   :  { %s19_s22 = sshll.u32 %s184_s21, 4  ;;  %s185_s26 = smov 128   ;;  %s20_s22 = int_to_ptr.vmem [resolvable:$true] %s19_s22 }
   0x4   :  { %s186_s27 = smov 8   ;;  %s187_s28 = smov [#allocation5]  }
   0x5   :  { %25 = dma.hbm_to_vmem [thread:$0]  %s18_s20, 256, %s20_s22, [#allocation4], %s185_s26, %s185_s26, %s186_s27  }
   0x6   :  { %s32_s29 = sshll.u32 %s187_s28, 4  ;;  %s33_s29 = int_to_ptr.vmem [resolvable:$true] %s32_s29 }
   0x7   :  { %38 = dma.hbm_to_vmem [thread:$0]  %s31_s25, 512, %s33_s29, [#allocation6], %s185_s26, %s185_s26, %s186_s27  }
   0x8   :  { %180 = dma.done.wait [#allocation4], 256  }
   0x9   :  { %181 = vsyncadd [#allocation4], 4294967040 }
   0xa   :  { %182 = dma.done.wait [#allocation6], 512  }
   0xb   :  { %183 = vsyncadd [#allocation6], 4294966784  ;;  %v58_v0 = vld [vmem:[#allocation5 + $0x18] sm:$0xff]  ;;  %v57_v1 = vld [vmem:[#allocation5 + $0x10] sm:$0xff]  ;;  %vm63_vm0 = vcmask 261120   ;;  %v108_v18 = vstv %s247_s4  ;;  %vm111_vm1 = vcmask 7168  }
   0xc   :  { %82 = vmatpush.msra.mxu0 %v58_v0  ;;  %122 = vmatpush.msra.mxu1 %v58_v0  ;;  %v56_v2 = vld [vmem:[#allocation5 + $0x8] sm:$0xff]  ;;  %v55_v3 = vld [vmem:[#allocation5] sm:$0xff]  ;;  %v53_v4 = vld [vmem:[#allocation3] sm:$0xff] }
   0xd   :  { %v54_v5 = vld [vmem:[#allocation3 + $0x8] sm:$0xff]  ;;  %v130_v6 = vld [vmem:[%s245_s2] ss:$0 sm:$0xff] }
   0xe   :  { %83 = vmatpush.msra.mxu0 %v57_v1  ;;  %123 = vmatpush.msra.mxu1 %v57_v1  ;;  %v131_v11 = vld [vmem:[%s246_s3] ss:$0 sm:$0xff] }
  0x10   :  { %84 = vmatpush.msra.mxu0 %v56_v2  ;;  %124 = vmatpush.msra.mxu1 %v56_v2 }
  0x12   :  { %85 = vmatpush.msra.mxu0 %v55_v3  ;;  %125 = vmatpush.msra.mxu1 %v55_v3 }
  0x13   :  { %120 = vmatmul.msk.f32.vlgmr.msra.gmra.mxu0 %vm63_vm0, %v53_v4  ;;  %121 = vmatmul.msk.f32.vlgmr.msra.gmra.mxu1 %vm63_vm0, %v54_v5 }
  0x90   :  { %v87_v7 = vpop.f32.mrf.mxu0  ;;  %v90_v8 = vpop.f32.mrf.mxu1 }
  0x91   :  { %v88_v9 = vadd.f32 %v130_v6, %v87_v7  ;;  %v91_v10 = vadd.f32 %v130_v6, %v90_v8 }
  0x93   :  { %v93_v12 = vmax.f32 %v88_v9, 0.0  ;;  %v94_v13 = vmax.f32 %v91_v10, 0.0 }
  0x95   :  { %v99_v14 = vmul.f32 %v131_v11, %v93_v12  ;;  %v100_v16 = vmul.f32 %v131_v11, %v94_v13 }
  0x97   :  { %v101_v15 = vsel %vm63_vm0, %v99_v14, 0.0  ;;  %v104_v17 = vsel %vm63_vm0, %v100_v16, 0.0 }
  0x98   :  { %102 = vadd.xlane.f32.xlu0 %v101_v15 }
  0xa0   :  { %105 = vadd.xlane.f32.xlu0 %v104_v17 }
 0x10b   :  { %v103_v19 = vpop.xlane.xlu0 %102 }
 0x10c   :  { %v109_v20 = vadd.f32 %v108_v18, %v103_v19 }
 0x10e   :  { %112 = vst.msk [vmem:[%s248_s5] sm:$0xff] %vm111_vm1, %v109_v20 }
 0x113   :  { %v106_v21 = vpop.xlane.xlu0 %105 }
 0x114   :  { %v110_v22 = vadd.f32 %v108_v18, %v106_v21 }
 0x116   :  { %113 = vst.msk [vmem:[%s248_s5 + $0x8] sm:$0xff] %vm111_vm1, %v110_v22 }
 0x117   :  { %118 = vsyncpa [#allocation4], 1 }
 0x118   :  { %119 = vsyncpa [#allocation6], 1 }

</bundles_post_ra>
